<compile_context>
chip_gen: v7x
topology: tpu7x:2x2x1
jax: 0.10.0
libtpu: 0.0.40
codegen_flags: <defaults>
</compile_context>

<pallas_src>
import functools

import jax
import jax.numpy as jnp
from jax.experimental import pallas as pl
from jax.experimental.pallas import tpu as pltpu


def _round_up(x, m):
    return ((x + m - 1) // m) * m


def _vmem_tile_bytes(shape, dtype):
    """Bytes one VMEM buffer of `shape` occupies after (sublane, lane) tiling."""
    shape = tuple(shape)
    if len(shape) == 1:
        shape = (1,) + shape
    itemsize = jnp.dtype(dtype).itemsize
    sublane = max(8, 32 // itemsize)          # 8 for f32, 16 for bf16
    rows = _round_up(shape[-2], sublane)
    cols = _round_up(shape[-1], 128)
    lead = 1
    for d in shape[:-2]:
        lead *= int(d)
    return lead * rows * cols * itemsize


def _policy_mlp_kernel(x_ref, w1_ref, b1_ref, w2_ref, b2_ref, w3_ref, b3_ref,
                       o_ref):
    """One batch tile of the MLP. Weights are (in, out) bf16; biases (1, out) f32."""
    # fc1 + ReLU (bf16 operands, f32 accumulate on the MXU)
    x = x_ref[...].astype(jnp.bfloat16)
    h1 = jnp.dot(x, w1_ref[...], preferred_element_type=jnp.float32) + b1_ref[...]
    h1 = jnp.maximum(h1, 0.0)

    # fc2 + ReLU
    h2 = jnp.dot(h1.astype(jnp.bfloat16), w2_ref[...],
                 preferred_element_type=jnp.float32) + b2_ref[...]
    h2 = jnp.maximum(h2, 0.0)

    # fc3 + clamp(-10, 10)
    logits = jnp.dot(h2.astype(jnp.bfloat16), w3_ref[...],
                     preferred_element_type=jnp.float32) + b3_ref[...]
    logits = jnp.clip(logits, -10.0, 10.0)

    # Numerically-stable softmax over the last dim (f32, exact normalization).
    m = jnp.max(logits, axis=-1, keepdims=True)
    e = jnp.exp(logits - m)
    denom = jnp.sum(e, axis=-1, keepdims=True)
    o_ref[...] = (e / denom).astype(o_ref.dtype)


def prepare_params(w1, b1, w2, b2, w3, b3):
    """One-time layout prep (do NOT call per forward): transpose PyTorch
    (out, in) weights to (in, out), cast weights to bf16 for the MXU, and lift
    biases to (1, out) f32 rows."""
    w1t = w1.T.astype(jnp.bfloat16)
    w2t = w2.T.astype(jnp.bfloat16)
    w3t = w3.T.astype(jnp.bfloat16)
    b1r = b1.reshape(1, -1).astype(jnp.float32)
    b2r = b2.reshape(1, -1).astype(jnp.float32)
    b3r = b3.reshape(1, -1).astype(jnp.float32)
    return (w1t, b1r, w2t, b2r, w3t, b3r)


@functools.partial(jax.jit, static_argnames=("block_batch",))
def policy_network_forward(x, w1t, b1r, w2t, b2r, w3t, b3r, *, block_batch=4096):
    """x: (B, input_size) f32. Prepared params from prepare_params().
    Returns (B, output_size) f32 probabilities."""
    batch, input_size = x.shape
    hidden = w1t.shape[1]
    out_size = w3t.shape[1]

    # Batch tile: large (amortize ~0.35us/step grid overhead), multiple of 8
    # sublanes, and capped so a large batch yields >= 2 grid steps (keeps both
    # v7x TensorCores busy via the "parallel" batch axis).  Tiny batches use
    # block == full batch (block dims equal to full array dims are always legal).
    if batch <= 8:
        tb = batch
    else:
        tb = min(_round_up(block_batch, 8), _round_up(pl.cdiv(batch, 2), 8))
    grid = (pl.cdiv(batch, tb),)

    const = lambda i: (0, 0)
    in_specs = [
        pl.BlockSpec((tb, input_size), lambda i: (i, 0)),   # x tile (pipelined)
        pl.BlockSpec(w1t.shape, const),                     # weights / biases:
        pl.BlockSpec(b1r.shape, const),                     # constant block index
        pl.BlockSpec(w2t.shape, const),                     # -> VMEM resident
        pl.BlockSpec(b2r.shape, const),
        pl.BlockSpec(w3t.shape, const),
        pl.BlockSpec(b3r.shape, const),
    ]
    out_spec = pl.BlockSpec((tb, out_size), lambda i: (i, 0))

    # VMEM budget with (sublane, lane) tiling accounted for:
    #   double-buffered x / out tiles, resident params (x2 for safety),
    #   headroom for f32 intermediates (h1 / h2 / bf16 copies).
    params = (w1t, b1r, w2t, b2r, w3t, b3r)
    param_bytes = sum(_vmem_tile_bytes(p.shape, p.dtype) for p in params)
    x_tile = _vmem_tile_bytes((tb, input_size), jnp.float32)
    out_tile = _vmem_tile_bytes((tb, out_size), jnp.float32)
    inter = 4 * _vmem_tile_bytes((tb, hidden), jnp.float32)
    vmem_bytes = 2 * (x_tile + out_tile) + 2 * param_bytes + inter + (8 << 20)
    vmem_bytes = max(16 << 20, min(int(vmem_bytes), 64 << 20))

    flops = 2 * batch * (input_size * hidden + hidden * hidden + hidden * out_size)
    bytes_accessed = (batch * input_size * 4                                   # x in
                      + sum(int(p.size) * p.dtype.itemsize for p in params)   # params
                      + batch * out_size * 4)                                 # probs out

    probs = pl.pallas_call(
        _policy_mlp_kernel,
        out_shape=jax.ShapeDtypeStruct((batch, out_size), jnp.float32),
        grid=grid,
        in_specs=in_specs,
        out_specs=out_spec,
        compiler_params=pltpu.CompilerParams(
            dimension_semantics=("parallel",),
            vmem_limit_bytes=vmem_bytes),
        cost_estimate=pl.CostEstimate(
            flops=int(flops),
            transcendentals=int(batch * out_size),
            bytes_accessed=int(bytes_accessed)),
    )(x, w1t, b1r, w2t, b2r, w3t, b3r)

    return probs


def xavier_uniform(key, out_features, in_features):
    """Matches torch.nn.init.xavier_uniform_ (gain=1)."""
    bound = (6.0 / (in_features + out_features)) ** 0.5
    return jax.random.uniform(key, (out_features, in_features),
                              dtype=jnp.float32, minval=-bound, maxval=bound)


def make_params(key, input_size, hidden_size, output_size):
    k1, k2, k3, kb1, kb2, kb3 = jax.random.split(key, 6)
    w1 = xavier_uniform(k1, hidden_size, input_size)
    w2 = xavier_uniform(k2, hidden_size, hidden_size)
    w3 = xavier_uniform(k3, output_size, hidden_size)
    # Module inits biases to zero; use small random biases here to exercise
    # the bias path in the correctness check (forward semantics unchanged —
    # the reference uses the exact same biases).
    b1 = 0.1 * jax.random.normal(kb1, (hidden_size,), jnp.float32)
    b2 = 0.1 * jax.random.normal(kb2, (hidden_size,), jnp.float32)
    b3 = 0.1 * jax.random.normal(kb3, (output_size,), jnp.float32)
    return w1, b1, w2, b2, w3, b3


def reference_forward(x, w1, b1, w2, b2, w3, b3):
    h1 = jnp.maximum(x @ w1.T + b1, 0.0)
    h2 = jnp.maximum(h1 @ w2.T + b2, 0.0)
    logits = jnp.clip(h2 @ w3.T + b3, -10.0, 10.0)
    return jax.nn.softmax(logits, axis=-1)


if __name__ == "__main__":
    input_size, hidden_size, output_size = 16, 32, 8

    key = jax.random.PRNGKey(0)
    kx, kx2, kp = jax.random.split(key, 3)
    params = make_params(kp, input_size, hidden_size, output_size)
    prepped = prepare_params(*params)

    # Case 1: small batch, single grid step (block == full batch).
    x = jax.random.normal(kx, (8, input_size), dtype=jnp.float32)
    out = jax.block_until_ready(policy_network_forward(x, *prepped))
    ref = reference_forward(x, *params)
    assert out.shape == (8, output_size)
    assert jnp.allclose(out, ref, atol=2e-2, rtol=2e-2), "mismatch vs reference (case 1)"
    assert jnp.allclose(jnp.sum(out, axis=-1), 1.0, atol=1e-3), "rows must sum to ~1 (case 1)"

    # Case 2: batch not a multiple of the tile -> multi-step cdiv grid with a
    # masked partial edge block (tests pipelining, edge masking, parallel axis).
    x2 = jax.random.normal(kx2, (20, input_size), dtype=jnp.float32)
    out2 = jax.block_until_ready(policy_network_forward(x2, *prepped))
    ref2 = reference_forward(x2, *params)
    assert out2.shape == (20, output_size)
    assert jnp.allclose(out2, ref2, atol=2e-2, rtol=2e-2), "mismatch vs reference (case 2)"
    assert jnp.allclose(jnp.sum(out2, axis=-1), 1.0, atol=1e-3), "rows must sum to ~1 (case 2)"

    print("KERNEL_OK")
</pallas_src>

<mosaic_0001>
module attributes {stable_mosaic.version = 11 : i64} {
  func.func @_policy_mlp_kernel(%arg0: i32, %arg1: memref<8x16xf32, #tpu.memory_space<vmem>>, %arg2: memref<16x32xbf16, #tpu.memory_space<vmem>>, %arg3: memref<1x32xf32, #tpu.memory_space<vmem>>, %arg4: memref<32x32xbf16, #tpu.memory_space<vmem>>, %arg5: memref<1x32xf32, #tpu.memory_space<vmem>>, %arg6: memref<32x8xbf16, #tpu.memory_space<vmem>>, %arg7: memref<1x8xf32, #tpu.memory_space<vmem>>, %arg8: memref<8x8xf32, #tpu.memory_space<vmem>>) attributes {dimension_semantics = [#tpu.dimension_semantics<parallel>], iteration_bounds = array<i64: 1>, scalar_prefetch = 0 : i64, scratch_operands = 0 : i64, tpu.core_type = #tpu.core_type<tc>, window_params = [{transform_indices = @transform_0, window_bounds = array<i64: 8, 16>}, {pipeline_mode = #tpu.pipeline_mode<synchronous>, transform_indices = @transform_1, window_bounds = array<i64: 16, 32>}, {pipeline_mode = #tpu.pipeline_mode<synchronous>, transform_indices = @transform_2, window_bounds = array<i64: 1, 32>}, {pipeline_mode = #tpu.pipeline_mode<synchronous>, transform_indices = @transform_3, window_bounds = array<i64: 32, 32>}, {pipeline_mode = #tpu.pipeline_mode<synchronous>, transform_indices = @transform_4, window_bounds = array<i64: 1, 32>}, {pipeline_mode = #tpu.pipeline_mode<synchronous>, transform_indices = @transform_5, window_bounds = array<i64: 32, 8>}, {pipeline_mode = #tpu.pipeline_mode<synchronous>, transform_indices = @transform_6, window_bounds = array<i64: 1, 8>}, {transform_indices = @transform_7, window_bounds = array<i64: 8, 8>}]} {
    %c0 = arith.constant 0 : index
    %c0_0 = arith.constant 0 : index
    %0 = vector.load %arg1[%c0, %c0_0] : memref<8x16xf32, #tpu.memory_space<vmem>>, vector<8x16xf32>
    %1 = arith.truncf %0 : vector<8x16xf32> to vector<8x16xbf16>
    %c0_1 = arith.constant 0 : index
    %c0_2 = arith.constant 0 : index
    %2 = vector.load %arg2[%c0_1, %c0_2] : memref<16x32xbf16, #tpu.memory_space<vmem>>, vector<16x32xbf16>
    %cst = arith.constant dense<0.000000e+00> : vector<8x32xf32>
    %3 = tpu.matmul %1, %2, %cst {dimension_numbers = #tpu.dot_dimension_numbers<[1], [0], [0], [1], [0, 0, 1, 1], [], []>} : vector<8x16xbf16>, vector<16x32xbf16>, vector<8x32xf32> -> vector<8x32xf32>
    %c0_3 = arith.constant 0 : index
    %c0_4 = arith.constant 0 : index
    %4 = vector.load %arg3[%c0_3, %c0_4] : memref<1x32xf32, #tpu.memory_space<vmem>>, vector<1x32xf32>
    %5 = vector.broadcast %4 : vector<1x32xf32> to vector<8x32xf32>
    %6 = arith.addf %3, %5 : vector<8x32xf32>
    %cst_5 = arith.constant 0.000000e+00 : f32
    %7 = vector.broadcast %cst_5 : f32 to vector<8x32xf32>
    %8 = arith.maximumf %6, %7 : vector<8x32xf32>
    %9 = arith.truncf %8 : vector<8x32xf32> to vector<8x32xbf16>
    %c0_6 = arith.constant 0 : index
    %c0_7 = arith.constant 0 : index
    %10 = vector.load %arg4[%c0_6, %c0_7] : memref<32x32xbf16, #tpu.memory_space<vmem>>, vector<32x32xbf16>
    %cst_8 = arith.constant dense<0.000000e+00> : vector<8x32xf32>
    %11 = tpu.matmul %9, %10, %cst_8 {dimension_numbers = #tpu.dot_dimension_numbers<[1], [0], [0], [1], [0, 0, 1, 1], [], []>} : vector<8x32xbf16>, vector<32x32xbf16>, vector<8x32xf32> -> vector<8x32xf32>
    %c0_9 = arith.constant 0 : index
    %c0_10 = arith.constant 0 : index
    %12 = vector.load %arg5[%c0_9, %c0_10] : memref<1x32xf32, #tpu.memory_space<vmem>>, vector<1x32xf32>
    %13 = vector.broadcast %12 : vector<1x32xf32> to vector<8x32xf32>
    %14 = arith.addf %11, %13 : vector<8x32xf32>
    %cst_11 = arith.constant 0.000000e+00 : f32
    %15 = vector.broadcast %cst_11 : f32 to vector<8x32xf32>
    %16 = arith.maximumf %14, %15 : vector<8x32xf32>
    %17 = arith.truncf %16 : vector<8x32xf32> to vector<8x32xbf16>
    %c0_12 = arith.constant 0 : index
    %c0_13 = arith.constant 0 : index
    %18 = vector.load %arg6[%c0_12, %c0_13] : memref<32x8xbf16, #tpu.memory_space<vmem>>, vector<32x8xbf16>
    %cst_14 = arith.constant dense<0.000000e+00> : vector<8x8xf32>
    %19 = tpu.matmul %17, %18, %cst_14 {dimension_numbers = #tpu.dot_dimension_numbers<[1], [0], [0], [1], [0, 0, 1, 1], [], []>} : vector<8x32xbf16>, vector<32x8xbf16>, vector<8x8xf32> -> vector<8x8xf32>
    %c0_15 = arith.constant 0 : index
    %c0_16 = arith.constant 0 : index
    %20 = vector.load %arg7[%c0_15, %c0_16] : memref<1x8xf32, #tpu.memory_space<vmem>>, vector<1x8xf32>
    %21 = vector.broadcast %20 : vector<1x8xf32> to vector<8x8xf32>
    %22 = arith.addf %19, %21 : vector<8x8xf32>
    %cst_17 = arith.constant -1.000000e+01 : f32
    %cst_18 = arith.constant 1.000000e+01 : f32
    %23 = vector.broadcast %cst_17 : f32 to vector<8x8xf32>
    %24 = arith.maximumf %23, %22 : vector<8x8xf32>
    %25 = vector.broadcast %cst_18 : f32 to vector<8x8xf32>
    %26 = arith.minimumf %25, %24 : vector<8x8xf32>
    %cst_19 = arith.constant dense<0xFF800000> : vector<8xf32>
    %27 = vector.multi_reduction <maximumf>, %26, %cst_19 [1] : vector<8x8xf32> to vector<8xf32>
    %28 = vector.shape_cast %27 : vector<8xf32> to vector<8x1xf32>
    %29 = vector.broadcast %28 : vector<8x1xf32> to vector<8x8xf32>
    %30 = arith.subf %26, %29 : vector<8x8xf32>
    %31 = math.exp %30 : vector<8x8xf32>
    %cst_20 = arith.constant dense<0.000000e+00> : vector<8xf32>
    %32 = vector.multi_reduction <add>, %31, %cst_20 [1] : vector<8x8xf32> to vector<8xf32>
    %33 = vector.shape_cast %32 : vector<8xf32> to vector<8x1xf32>
    %34 = vector.broadcast %33 : vector<8x1xf32> to vector<8x8xf32>
    %35 = arith.divf %31, %34 : vector<8x8xf32>
    %c0_21 = arith.constant 0 : index
    %c0_22 = arith.constant 0 : index
    %36 = vector.load %arg8[%c0_21, %c0_22] : memref<8x8xf32, #tpu.memory_space<vmem>>, vector<8x8xf32>
    tpu.vector_store %arg8[%c0_21, %c0_22], %35 {strides = array<i32>} : memref<8x8xf32, #tpu.memory_space<vmem>>, vector<8x8xf32>,
    return
  }
  func.func @transform_0(%arg0: i32) -> (i32, i32) {
    %c0_i32 = arith.constant 0 : i32
    %c0_i32_0 = arith.constant 0 : i32
    return %arg0, %c0_i32 : i32, i32
  }
  func.func @transform_1(%arg0: i32) -> (i32, i32) {
    %c0_i32 = arith.constant 0 : i32
    %c0_i32_0 = arith.constant 0 : i32
    %c0_i32_1 = arith.constant 0 : i32
    return %c0_i32, %c0_i32_0 : i32, i32
  }
  func.func @transform_2(%arg0: i32) -> (i32, i32) {
    %c0_i32 = arith.constant 0 : i32
    %c0_i32_0 = arith.constant 0 : i32
    %c0_i32_1 = arith.constant 0 : i32
    return %c0_i32, %c0_i32_0 : i32, i32
  }
  func.func @transform_3(%arg0: i32) -> (i32, i32) {
    %c0_i32 = arith.constant 0 : i32
    %c0_i32_0 = arith.constant 0 : i32
    %c0_i32_1 = arith.constant 0 : i32
    return %c0_i32, %c0_i32_0 : i32, i32
  }
  func.func @transform_4(%arg0: i32) -> (i32, i32) {
    %c0_i32 = arith.constant 0 : i32
    %c0_i32_0 = arith.constant 0 : i32
    %c0_i32_1 = arith.constant 0 : i32
    return %c0_i32, %c0_i32_0 : i32, i32
  }
  func.func @transform_5(%arg0: i32) -> (i32, i32) {
    %c0_i32 = arith.constant 0 : i32
    %c0_i32_0 = arith.constant 0 : i32
    %c0_i32_1 = arith.constant 0 : i32
    return %c0_i32, %c0_i32_0 : i32, i32
  }
  func.func @transform_6(%arg0: i32) -> (i32, i32) {
    %c0_i32 = arith.constant 0 : i32
    %c0_i32_0 = arith.constant 0 : i32
    %c0_i32_1 = arith.constant 0 : i32
    return %c0_i32, %c0_i32_0 : i32, i32
  }
  func.func @transform_7(%arg0: i32) -> (i32, i32) {
    %c0_i32 = arith.constant 0 : i32
    %c0_i32_0 = arith.constant 0 : i32
    return %arg0, %c0_i32 : i32, i32
  }
}

</mosaic_0001>

<bundles_post_ra>
// kernel: policy_network_forward.1
= control target key start
LH: loop header
LB: loop body
LE: loop exit
PB: predicated region body
PF: predicated region fallthrough
CT: control target
= control target key end

     0   :  { %12 = vsyncpa [#allocation3], 0  ;;  %s472_s0 = inlined_call_operand.vmem [shape: f32[8,16], index: 0, kind: input, shape index: {}]   ;;  %s473_s1 = inlined_call_operand.hbm [shape: bf16[16,32], index: 1, kind: input, shape index: {}]   ;;  %s474_s2 = inlined_call_operand.vmem [shape: f32[1,32], index: 2, kind: input, shape index: {}]   ;;  %s475_s3 = inlined_call_operand.vmem [shape: bf16[32,32], index: 3, kind: input, shape index: {}]   ;;  %s476_s4 = inlined_call_operand.vmem [shape: f32[1,32], index: 4, kind: input, shape index: {}]   ;;  %s477_s5 = inlined_call_operand.vmem [shape: bf16[32,8], index: 5, kind: input, shape index: {}]   ;;  %s478_s6 = inlined_call_operand.vmem [shape: f32[1,8], index: 6, kind: input, shape index: {}]   ;;  %s479_s7 = inlined_call_operand.hbm [shape: f32[8,8], index: 7, kind: output, shape index: {}]  }
   0x1   :  { %13 = vsyncpa [#allocation4], 0  ;;  %s375_s24 = smov [#allocation2]   ;;  %s327_s28 = scalar_lea.hbm %s473_s1, 128 }
   0x2   :  { %s21_s25 = sshll.u32 %s375_s24, 4  ;;  %p328_p0 = scmp.ne.s32.totalorder %s473_s1, %s327_s28  ;;  %s22_s25 = int_to_ptr.vmem [resolvable:$true] %s21_s25 }
   0x3   :  { %p331_p1 = scmp.lt.u32.totalorder %s327_s28, %s473_s1 }
   0x5   :  { %p333_p2 = pnand %p331_p1, %p328_p0 }
   0x7   :  { %336 = shalt.err (!%p333_p2)
}
   0x8   :  { %s337_s10 = scalar_lea.vmem %s22_s25, 128  ;;  %p342_p4 = scmp.lt.s32.totalorder %s22_s25, %s22_s25 }
   0x9   :  { %p338_p3 = scmp.ne.s32.totalorder %s22_s25, %s337_s10  ;;  %p343_p5 = scmp.lt.s32.totalorder %s337_s10, %s337_s10 }
   0xb   :  { %p344_p6 = por %p343_p5, %p342_p4 }
   0xd   :  { %p345_p7 = pnand %p344_p6, %p338_p3 }
   0xf   :  { %348 = shalt.err (!%p345_p7)
}
  0x10   :  { %s376_s11 = smov 64   ;;  %s377_s12 = smov 4  }
  0x11   :  { %27 = dma.hbm_to_vmem [thread:$0]  %s473_s1, 128, %s22_s25, [#allocation3], %s376_s11, %s376_s11, %s377_s12  }
  0x12   :  { %371 = dma.done.wait [#allocation3], 128  }
  0x13   :  { %372 = vsyncadd [#allocation3], 4294967168  ;;  %v378_v0 = vmov 0.0   ;;  %vm379_vm0 = vmmov 0   ;;  %v318_v1 = vld [vmem:[#allocation2] sm:$0xff]   ;;  %vm59_vm1 = vcmask 130048  }
  0x14   :  { %290 = vmatprep.subr.bf16.mxu0 %v378_v0  ;;  %292 = vmatprep.mubr.msk.bf16.mxu0 %vm379_vm0, %v378_v0  ;;  %v42_v2 = vld [vmem:[%s472_s0] sm:$0xff]  ;;  %v320_v5 = vld [vmem:[%s475_s3 + $0x8] sm:$0xff]   ;;  %vm128_vm2 = vcmask 261120   ;;  %vm242_vm3 = vcmask 64512  }
  0x15   :  { %296 = vmatprep.subr.bf16.mxu1 %v378_v0  ;;  %300 = vmatprep.mubr.msk.bf16.mxu1 %vm379_vm0, %v378_v0  ;;  %v43_v3 = vpack.c.bf16 %v42_v2, %v42_v2  ;;  %v319_v4 = vld [vmem:[%s475_s3] sm:$0xff]   ;;  %v322_v15 = vld [vmem:[%s477_s5 + $0x8] sm:$0xff]  }
  0x16   :  { %291 = vmatpush3.bf16.msra.mxu0 %v318_v1  ;;  %297 = vmatpush3.bf16.msra.mxu1 %v319_v4  ;;  %v321_v6 = vld [vmem:[%s477_s5] sm:$0xff]  }
  0x17   :  { %304 = vmatprep.subr.bf16.mxu0 %v378_v0  ;;  %298 = vmatprep.subr.bf16.mxu1 %v378_v0  ;;  %v270_v7 = vld [vmem:[%s474_s2] ss:$0 sm:$0xff] }
  0x18   :  { %v273_v16 = vld [vmem:[%s476_s4] ss:$0 sm:$0xff]  ;;  %s380_s4 = smov [#allocation5]  }
  0x19   :  { %293 = vmatmul.mubr.msk.bf16.vlgmr.msra.gmra.mrb[0].mxu0 %vm59_vm1, %v43_v3  ;;  %v277_v24 = vld [vmem:[%s478_s6] ss:$0 sm:$0xff]  ;;  %s261_s5 = sshll.u32 %s380_s4, 4  ;;  %s262_s5 = int_to_ptr.vmem [resolvable:$true] %s261_s5 }
  0x1a   :  { %308 = vmatprep.mubr.msk.bf16.mxu0 %vm379_vm0, %v378_v0  ;;  %299 = vmatpush3.bf16.msra.mxu1 %v320_v5  ;;  %s349_s6 = scalar_lea.vmem %s262_s5, 128  ;;  %p354_p9 = scmp.lt.s32.totalorder %s262_s5, %s262_s5 }
  0x1b   :  { %305 = vmatpush3.bf16.msra.mxu0 %v321_v6  ;;  %p350_p8 = scmp.ne.s32.totalorder %s262_s5, %s349_s6  ;;  %p355_p10 = scmp.lt.s32.totalorder %s349_s6, %s349_s6 }
  0x1c   :  { %306 = vmatprep.subr.bf16.mxu0 %v378_v0 }
  0x1d   :  { %p356_p11 = por %p355_p10, %p354_p9 }
  0x1f   :  { %307 = vmatpush3.bf16.msra.mxu0 %v322_v15  ;;  %p357_p12 = pnand %p356_p11, %p350_p8 }
  0xec   :  { %v97_v8 = vpop.f32.mrb[0].mxu0 }
  0xed   :  { %v98_v9 = vadd.f32 %v270_v7, %v97_v8  ;;  %v294_v10 = vpop.f32.mrb[1].mxu0 }
  0xee   :  { %v100_v11 = vpop.f32.mrb[2].mxu0 }
  0xef   :  { %v103_v12 = vmax.f32 %v98_v9, 0.0  ;;  %v295_v13 = vpop.f32.mrb[3].mxu0 }
  0xf1   :  { %v104_v14 = vpack.c.bf16 %v103_v12, %v103_v12 }
  0xf3   :  { %301 = vmatmul.mubr.msk.bf16.vlgmr.msra.gmra.mrb[0].mxu1 %vm128_vm2, %v104_v14 }
 0x1c6   :  { %v166_v17 = vpop.f32.mrb[0].mxu1 }
 0x1c7   :  { %v167_v18 = vadd.f32 %v273_v16, %v166_v17  ;;  %v302_v19 = vpop.f32.mrb[1].mxu1 }
 0x1c8   :  { %v169_v20 = vpop.f32.mrb[2].mxu1 }
 0x1c9   :  { %v172_v21 = vmax.f32 %v167_v18, 0.0  ;;  %v303_v22 = vpop.f32.mrb[3].mxu1 }
 0x1cb   :  { %v173_v23 = vpack.c.bf16 %v172_v21, %v172_v21 }
 0x1cd   :  { %309 = vmatmul.mubr.msk.bf16.vlgmr.msra.gmra.mrb[4].mxu0 %vm128_vm2, %v173_v23 }
 0x2a0   :  { %v234_v25 = vpop.f32.mrb[4].mxu0 }
 0x2a1   :  { %v235_v26 = vadd.f32 %v277_v24, %v234_v25  ;;  %v310_v27 = vpop.f32.mrb[5].mxu0 }
 0x2a2   :  { %v237_v28 = vpop.f32.mrb[6].mxu0 }
 0x2a3   :  { %v281_v29 = vclamps-f32 %v235_v26, 10.0  ;;  %v311_v30 = vpop.f32.mrb[7].mxu0 }
 0x2a5   :  { %v243_v31 = vsel %vm242_vm3, %v281_v29, -inf }
 0x2a6   :  { %244 = vmax.xlane.f32.xlu0 %v243_v31 }
 0x333   :  { %v245_v32 = vpop.xlane.xlu0 %244 }
 0x334   :  { %v246_v33 = vsub.f32 %v281_v29, %v245_v32 }
 0x336   :  { %v247_v34 = vmul.f32 1.442695, %v246_v33 }
 0x338   :  { %323 = vpow2.f32 %v247_v34 }
 0x342   :  { %v324_v35 = vpop.eup %323 }
 0x343   :  { %v249_v36 = vsel %vm242_vm3, %v324_v35, 0.0 }
 0x344   :  { %250 = vadd.xlane.f32.xlu0 %v249_v36 }
 0x3d1   :  { %v251_v37 = vpop.xlane.xlu0 %250 }
 0x3d2   :  { %325 = vrcp.f32 %v251_v37 }
 0x3dc   :  { %v326_v38 = vpop.eup %325 }
 0x3dd   :  { %v253_v39 = vmul.f32 %v326_v38, %v324_v35 }
 0x3df   :  { %254 = vst.msk [vmem:[#allocation5] sm:$0xff] %vm242_vm3, %v253_v39 }
 0x3e0   :  { %360 = shalt.err (!%p357_p12)
}
 0x3e1   :  { %s361_s29 = scalar_lea.hbm %s479_s7, 128 }
 0x3e2   :  { %p362_p13 = scmp.ne.s32.totalorder %s479_s7, %s361_s29  ;;  %p365_p0 = scmp.lt.u32.totalorder %s361_s29, %s479_s7 }
 0x3e4   :  { %p367_p1 = pnand %p365_p0, %p362_p13 }
 0x3e6   :  { %370 = shalt.err (!%p367_p1)
}
 0x3e7   :  { %264 = dma.vmem_to_hbm [thread:$0]  %s262_s5, 128, %s479_s7, [#allocation4]  }
 0x3e8   :  { %373 = dma.done.wait [#allocation4], 128  }
 0x3e9   :  { %374 = vsyncadd [#allocation4], 4294967168 }
 0x3ea   :  { %268 = vsyncpa [#allocation3], 1 }
 0x3eb   :  { %269 = vsyncpa [#allocation4], 1 }

</bundles_post_ra>
